<compile_context>
chip_gen: v7x
topology: tpu7x:2x2x1
jax: 0.10.0
libtpu: 0.0.40
codegen_flags: <defaults>
</compile_context>

<pallas_src>
import functools

import jax
import jax.numpy as jnp
from jax.experimental import pallas as pl
from jax.experimental.pallas import tpu as pltpu


# ------------------------------- fused kernel --------------------------------

def _byol_kernel(x_ref,
                 cw_ref, cb_ref, fw_ref, fb_ref,
                 w1_ref, b1_ref, g_ref, beta_ref, w2_ref, b2_ref,
                 loss_ref, *, B, H, W, D):
    """One grid step == one augmented view (online + target fused along N)."""
    f32, bf16 = jnp.float32, jnp.bfloat16
    R = B * H                                    # pixel rows of this view

    x2 = x_ref[0]                                # (R, W*C) f32 pixel rows

    # Vertical taps via masked sublane rolls (image boundaries zeroed), then
    # lane-concat -> one banded MXU matmul with K = 3*W*C.
    r_iota = jax.lax.broadcasted_iota(jnp.int32, (R, 1), 0)
    h_in = (r_iota & (H - 1)) if (H & (H - 1)) == 0 else (r_iota % H)
    not_top = (h_in > 0).astype(f32)             # kill row h-1 at image top
    not_bot = (h_in < H - 1).astype(f32)         # kill row h+1 at image bottom
    x_cat = jnp.concatenate(
        [pltpu.roll(x2, 1, 0) * not_top,         # input row h-1
         x2,                                     # input row h
         pltpu.roll(x2, R - 1, 0) * not_bot],    # input row h+1
        axis=1).astype(bf16)                     # (R, 3*W*C)

    # 3x3 SAME conv, online|target stacked on N=256: single matmul + bias + ReLU
    acc = jnp.dot(x_cat, cw_ref[...], preferred_element_type=f32)
    acc = jnp.maximum(acc + cb_ref[...], 0.0)    # (R, 2*W*Cmid)

    # GAP folded into a tiny bf16 pooling matmul *before* the projection.
    colr = jax.lax.broadcasted_iota(jnp.int32, (B, R), 1)
    rowb = jax.lax.broadcasted_iota(jnp.int32, (B, R), 0)
    pool = jnp.where((colr >= rowb * H) & (colr < (rowb + 1) * H),
                     1.0 / (H * W), 0.0).astype(bf16)            # (B, R)
    pooled = jnp.dot(pool, acc.astype(bf16), preferred_element_type=f32)

    # Block-diagonal (online ⊕ target) projection: (B,256)@(256,256).
    proj = jnp.dot(pooled.astype(bf16), fw_ref[...],
                   preferred_element_type=f32) + fb_ref[...]
    on_proj = proj[:, :D]                        # online projection  (B, D)
    tg_proj = proj[:, D:]                        # target projection  (B, D)

    # Predictor: Linear -> BatchNorm1d (train mode, this view's batch) -> ReLU -> Linear
    h = jnp.dot(on_proj.astype(bf16), w1_ref[...],
                preferred_element_type=f32) + b1_ref[...]
    mean = jnp.mean(h, axis=0, keepdims=True)
    d = h - mean
    var = jnp.mean(d * d, axis=0, keepdims=True)                 # biased, as BN uses
    hn = jnp.maximum(d * jax.lax.rsqrt(var + 1e-5) * g_ref[...] + beta_ref[...], 0.0)
    preds = jnp.dot(hn.astype(bf16), w2_ref[...],
                    preferred_element_type=f32) + b2_ref[...]    # (B, P)

    # BYOL loss for this view (same-view pairing, as in the reference forward()).
    def _l2_normalize(v):                        # F.normalize, eps=1e-12
        n = jnp.sqrt(jnp.sum(v * v, axis=-1, keepdims=True))
        return v / jnp.maximum(n, 1e-12)

    cos = jnp.sum(_l2_normalize(preds) * _l2_normalize(tg_proj),
                  axis=-1, keepdims=True)                        # (B, 1)
    partial = jnp.sum(2.0 - 2.0 * cos, axis=0, keepdims=True) * (1.0 / B)  # (1,1)
    loss_ref[...] = jnp.broadcast_to(partial, loss_ref.shape)    # lane-dense store


# -------------------------------- JAX wrapper ---------------------------------

def byol_forward(image1, image2, p):
    """Fused Pallas call: grid over the two views, both TCs on v7x."""
    B, C, H, W = image1.shape
    D = p["pw1"].shape[0]

    def rows(img):   # NCHW -> lane-dense (B*H, W*C) pixel rows (no W padding)
        return jnp.transpose(img, (0, 2, 3, 1)).reshape(B * H, W * C)

    x = jnp.stack([rows(image1), rows(image2)], axis=0)          # (2, B*H, W*C)

    weights = [p[k] for k in
               ("cw", "cb", "fw", "fb", "pw1", "pb1", "pg", "pbeta", "pw2", "pb2")]

    def _full(a):                                                # whole-array VMEM block
        return pl.BlockSpec(a.shape, lambda v, _nd=a.ndim: (0,) * _nd)

    kernel = functools.partial(_byol_kernel, B=B, H=H, W=W, D=D)
    out = pl.pallas_call(
        kernel,
        grid=(2,),
        out_shape=jax.ShapeDtypeStruct((16, 128), jnp.float32),
        in_specs=[pl.BlockSpec((1, B * H, W * C), lambda v: (v, 0, 0))]
                 + [_full(w) for w in weights],
        out_specs=pl.BlockSpec((8, 128), lambda v: (v, 0)),
        compiler_params=pltpu.CompilerParams(dimension_semantics=("parallel",)),
    )(x, *weights)
    # loss = mean_b(l1[b] + l2[b]) = partial_view1 + partial_view2
    return out[0, 0] + out[8, 0]


# --------------------------- deterministic init -------------------------------

def init_params(key, c_in=4, c_mid=8, represent_dim=128, hidden=128,
                projection_size=128, width=16):
    ks = jax.random.split(key, 8)
    # torch-convention parameters
    conv_w = 0.1 * jax.random.normal(ks[0], (c_mid, c_in, 3, 3), jnp.float32)  # OIHW
    conv_b = 0.01 * jax.random.normal(ks[1], (c_mid,), jnp.float32)
    fc_w = 0.1 * jax.random.normal(ks[2], (c_mid, represent_dim), jnp.float32)
    fc_b = 0.01 * jax.random.normal(ks[3], (represent_dim,), jnp.float32)

    # Banded conv weight: horizontal taps + SAME-pad edge zeros folded into a
    # (W*C -> W*Cmid) banded matrix per vertical shift; the 3 vertical shifts
    # are stacked along K, giving one (3*W*C, W*Cmid) weight per branch.
    w_tap = jnp.transpose(conv_w, (2, 3, 1, 0))                   # (3, 3, C, Cmid)
    j = jnp.arange(width)
    sel = jnp.stack([(j[None, :] + dj - 1 == j[:, None]).astype(jnp.float32)
                     for dj in range(3)], axis=0)                 # (3, W_in, W_out)
    banded = jnp.einsum("dij,vdcm->vicjm", sel, w_tap)
    banded = banded.reshape(3 * width * c_in, width * c_mid)      # (3*W*C, W*Cmid)

    enc = {
        "cw": banded,                                             # (3*W*C, W*Cmid)
        "cb": jnp.tile(conv_b[None, :], (1, width)),              # (1, W*Cmid)
        "fw": jnp.tile(fc_w, (width, 1)),                         # (W*Cmid, D), GAP-folded
        "fb": fc_b[None, :],                                      # (1, D)
    }
    # target_encoder_projector = copy.deepcopy(online_encoder_projector)
    target_enc = {k: v for k, v in enc.items()}

    pred = {
        "w1": 0.1 * jax.random.normal(ks[4], (represent_dim, hidden), jnp.float32),
        "b1": 0.01 * jax.random.normal(ks[5], (1, hidden), jnp.float32),
        "g": jnp.ones((1, hidden), jnp.float32),
        "beta": jnp.zeros((1, hidden), jnp.float32),
        "w2": 0.1 * jax.random.normal(ks[6], (hidden, projection_size), jnp.float32),
        "b2": 0.01 * jax.random.normal(ks[7], (1, projection_size), jnp.float32),
    }
    return enc, target_enc, pred


def pack_params(online_enc, target_enc, pred):
    """Fuse online+target along N (fills the 256-wide MXU) and cast to bf16."""
    bf16 = jnp.bfloat16
    z_ot = jnp.zeros((online_enc["fw"].shape[0], target_enc["fw"].shape[1]), jnp.float32)
    z_to = jnp.zeros((target_enc["fw"].shape[0], online_enc["fw"].shape[1]), jnp.float32)
    fw_bd = jnp.concatenate(
        [jnp.concatenate([online_enc["fw"], z_ot], axis=1),
         jnp.concatenate([z_to, target_enc["fw"]], axis=1)], axis=0)   # (2*W*Cmid, 2*D)
    return {
        "cw": jnp.concatenate([online_enc["cw"], target_enc["cw"]], axis=1).astype(bf16),
        "cb": jnp.concatenate([online_enc["cb"], target_enc["cb"]], axis=1),
        "fw": fw_bd.astype(bf16),
        "fb": jnp.concatenate([online_enc["fb"], target_enc["fb"]], axis=1),
        "pw1": pred["w1"].astype(bf16), "pb1": pred["b1"],
        "pg": pred["g"], "pbeta": pred["beta"],
        "pw2": pred["w2"].astype(bf16), "pb2": pred["b2"],
    }


# --------------------------------- main ---------------------------------------

if __name__ == "__main__":
    key = jax.random.PRNGKey(0)
    k_img1, k_img2, k_par = jax.random.split(key, 3)

    B, C, H, W = 2, 4, 16, 16
    image1 = jax.random.normal(k_img1, (B, C, H, W), jnp.float32)
    image2 = jax.random.normal(k_img2, (B, C, H, W), jnp.float32)

    online_enc, target_enc, pred = init_params(k_par, c_in=C, width=W)
    kparams = pack_params(online_enc, target_enc, pred)

    fwd = jax.jit(byol_forward)
    loss = fwd(image1, image2, kparams)
    jax.block_until_ready(loss)
    assert loss.shape == () and bool(jnp.isfinite(loss))
    print("KERNEL_OK")
</pallas_src>

<mosaic_0001>
module attributes {stable_mosaic.version = 11 : i64} {
  func.func @_byol_kernel(%arg0: i32, %arg1: memref<1x32x64xf32, #tpu.memory_space<vmem>>, %arg2: memref<192x256xbf16, #tpu.memory_space<vmem>>, %arg3: memref<1x256xf32, #tpu.memory_space<vmem>>, %arg4: memref<256x256xbf16, #tpu.memory_space<vmem>>, %arg5: memref<1x256xf32, #tpu.memory_space<vmem>>, %arg6: memref<128x128xbf16, #tpu.memory_space<vmem>>, %arg7: memref<1x128xf32, #tpu.memory_space<vmem>>, %arg8: memref<1x128xf32, #tpu.memory_space<vmem>>, %arg9: memref<1x128xf32, #tpu.memory_space<vmem>>, %arg10: memref<128x128xbf16, #tpu.memory_space<vmem>>, %arg11: memref<1x128xf32, #tpu.memory_space<vmem>>, %arg12: memref<8x128xf32, #tpu.memory_space<vmem>>) attributes {dimension_semantics = [#tpu.dimension_semantics<parallel>], iteration_bounds = array<i64: 2>, scalar_prefetch = 0 : i64, scratch_operands = 0 : i64, tpu.core_type = #tpu.core_type<tc>, window_params = [{transform_indices = @transform_0, window_bounds = array<i64: 1, 32, 64>}, {pipeline_mode = #tpu.pipeline_mode<synchronous>, transform_indices = @transform_1, window_bounds = array<i64: 192, 256>}, {pipeline_mode = #tpu.pipeline_mode<synchronous>, transform_indices = @transform_2, window_bounds = array<i64: 1, 256>}, {pipeline_mode = #tpu.pipeline_mode<synchronous>, transform_indices = @transform_3, window_bounds = array<i64: 256, 256>}, {pipeline_mode = #tpu.pipeline_mode<synchronous>, transform_indices = @transform_4, window_bounds = array<i64: 1, 256>}, {pipeline_mode = #tpu.pipeline_mode<synchronous>, transform_indices = @transform_5, window_bounds = array<i64: 128, 128>}, {pipeline_mode = #tpu.pipeline_mode<synchronous>, transform_indices = @transform_6, window_bounds = array<i64: 1, 128>}, {pipeline_mode = #tpu.pipeline_mode<synchronous>, transform_indices = @transform_7, window_bounds = array<i64: 1, 128>}, {pipeline_mode = #tpu.pipeline_mode<synchronous>, transform_indices = @transform_8, window_bounds = array<i64: 1, 128>}, {pipeline_mode = #tpu.pipeline_mode<synchronous>, transform_indices = @transform_9, window_bounds = array<i64: 128, 128>}, {pipeline_mode = #tpu.pipeline_mode<synchronous>, transform_indices = @transform_10, window_bounds = array<i64: 1, 128>}, {transform_indices = @transform_11, window_bounds = array<i64: 8, 128>}]} {
    %c0 = arith.constant 0 : index
    %c0_0 = arith.constant 0 : index
    %c0_1 = arith.constant 0 : index
    %0 = vector.load %arg1[%c0, %c0_0, %c0_1] : memref<1x32x64xf32, #tpu.memory_space<vmem>>, vector<1x32x64xf32>
    %1 = vector.shape_cast %0 : vector<1x32x64xf32> to vector<32x64xf32>
    %2 = tpu.iota {dimensions = array<i32: 0>} : vector<32x1xi32>
    %c15_i32 = arith.constant 15 : i32
    %3 = vector.broadcast %c15_i32 : i32 to vector<32x1xi32>
    %4 = arith.andi %2, %3 : vector<32x1xi32>
    %c0_i32 = arith.constant 0 : i32
    %5 = vector.broadcast %c0_i32 : i32 to vector<32x1xi32>
    %6 = arith.cmpi sgt, %4, %5 : vector<32x1xi32>
    %7 = arith.extui %6 : vector<32x1xi1> to vector<32x1xi32>
    %8 = arith.sitofp %7 : vector<32x1xi32> to vector<32x1xf32>
    %c15_i32_2 = arith.constant 15 : i32
    %9 = vector.broadcast %c15_i32_2 : i32 to vector<32x1xi32>
    %10 = arith.cmpi slt, %4, %9 : vector<32x1xi32>
    %11 = arith.extui %10 : vector<32x1xi1> to vector<32x1xi32>
    %12 = arith.sitofp %11 : vector<32x1xi32> to vector<32x1xf32>
    %c1_i32 = arith.constant 1 : i32
    %13 = tpu.dynamic_rotate %1 by %c1_i32 dim 0 : vector<32x64xf32>, i32 -> vector<32x64xf32>
    %14 = vector.broadcast %8 : vector<32x1xf32> to vector<32x64xf32>
    %15 = arith.mulf %13, %14 : vector<32x64xf32>
    %c31_i32 = arith.constant 31 : i32
    %16 = tpu.dynamic_rotate %1 by %c31_i32 dim 0 : vector<32x64xf32>, i32 -> vector<32x64xf32>
    %17 = vector.broadcast %12 : vector<32x1xf32> to vector<32x64xf32>
    %18 = arith.mulf %16, %17 : vector<32x64xf32>
    %19 = tpu.concatenate %15, %1, %18 in 1 : vector<32x64xf32>, vector<32x64xf32>, vector<32x64xf32> -> vector<32x192xf32>
    %20 = arith.truncf %19 : vector<32x192xf32> to vector<32x192xbf16>
    %c0_3 = arith.constant 0 : index
    %c0_4 = arith.constant 0 : index
    %21 = vector.load %arg2[%c0_3, %c0_4] : memref<192x256xbf16, #tpu.memory_space<vmem>>, vector<192x256xbf16>
    %cst = arith.constant dense<0.000000e+00> : vector<32x256xf32>
    %22 = tpu.matmul %20, %21, %cst {dimension_numbers = #tpu.dot_dimension_numbers<[1], [0], [0], [1], [0, 0, 1, 1], [], []>} : vector<32x192xbf16>, vector<192x256xbf16>, vector<32x256xf32> -> vector<32x256xf32>
    %c0_5 = arith.constant 0 : index
    %c0_6 = arith.constant 0 : index
    %23 = vector.load %arg3[%c0_5, %c0_6] : memref<1x256xf32, #tpu.memory_space<vmem>>, vector<1x256xf32>
    %24 = vector.broadcast %23 : vector<1x256xf32> to vector<32x256xf32>
    %25 = arith.addf %22, %24 : vector<32x256xf32>
    %cst_7 = arith.constant 0.000000e+00 : f32
    %26 = vector.broadcast %cst_7 : f32 to vector<32x256xf32>
    %27 = arith.maximumf %25, %26 : vector<32x256xf32>
    %28 = tpu.iota {dimensions = array<i32: 1>} : vector<2x32xi32>
    %29 = tpu.iota {dimensions = array<i32: 0>} : vector<2x32xi32>
    %c16_i32 = arith.constant 16 : i32
    %30 = vector.broadcast %c16_i32 : i32 to vector<2x32xi32>
    %31 = arith.muli %29, %30 : vector<2x32xi32>
    %32 = arith.cmpi sge, %28, %31 : vector<2x32xi32>
    %c1_i32_8 = arith.constant 1 : i32
    %33 = vector.broadcast %c1_i32_8 : i32 to vector<2x32xi32>
    %34 = arith.addi %29, %33 : vector<2x32xi32>
    %c16_i32_9 = arith.constant 16 : i32
    %35 = vector.broadcast %c16_i32_9 : i32 to vector<2x32xi32>
    %36 = arith.muli %34, %35 : vector<2x32xi32>
    %37 = arith.cmpi slt, %28, %36 : vector<2x32xi32>
    %38 = arith.andi %32, %37 : vector<2x32xi1>
    %cst_10 = arith.constant 3.906250e-03 : f32
    %cst_11 = arith.constant 0.000000e+00 : f32
    %39 = vector.broadcast %cst_10 : f32 to vector<2x32xf32>
    %40 = vector.broadcast %cst_11 : f32 to vector<2x32xf32>
    %41 = arith.select %38, %39, %40 : vector<2x32xi1>, vector<2x32xf32>
    %42 = arith.truncf %41 : vector<2x32xf32> to vector<2x32xbf16>
    %43 = arith.truncf %27 : vector<32x256xf32> to vector<32x256xbf16>
    %cst_12 = arith.constant dense<0.000000e+00> : vector<2x256xf32>
    %44 = tpu.matmul %42, %43, %cst_12 {dimension_numbers = #tpu.dot_dimension_numbers<[1], [0], [0], [1], [0, 0, 1, 1], [], []>} : vector<2x32xbf16>, vector<32x256xbf16>, vector<2x256xf32> -> vector<2x256xf32>
    %45 = arith.truncf %44 : vector<2x256xf32> to vector<2x256xbf16>
    %c0_13 = arith.constant 0 : index
    %c0_14 = arith.constant 0 : index
    %46 = vector.load %arg4[%c0_13, %c0_14] : memref<256x256xbf16, #tpu.memory_space<vmem>>, vector<256x256xbf16>
    %cst_15 = arith.constant dense<0.000000e+00> : vector<2x256xf32>
    %47 = tpu.matmul %45, %46, %cst_15 {dimension_numbers = #tpu.dot_dimension_numbers<[1], [0], [0], [1], [0, 0, 1, 1], [], []>} : vector<2x256xbf16>, vector<256x256xbf16>, vector<2x256xf32> -> vector<2x256xf32>
    %c0_16 = arith.constant 0 : index
    %c0_17 = arith.constant 0 : index
    %48 = vector.load %arg5[%c0_16, %c0_17] : memref<1x256xf32, #tpu.memory_space<vmem>>, vector<1x256xf32>
    %49 = vector.broadcast %48 : vector<1x256xf32> to vector<2x256xf32>
    %50 = arith.addf %47, %49 : vector<2x256xf32>
    %51 = vector.extract_strided_slice %50 {offsets = [0, 0], sizes = [2, 128], strides = [1, 1]} : vector<2x256xf32> to vector<2x128xf32>
    %52 = vector.extract_strided_slice %50 {offsets = [0, 128], sizes = [2, 128], strides = [1, 1]} : vector<2x256xf32> to vector<2x128xf32>
    %53 = arith.truncf %51 : vector<2x128xf32> to vector<2x128xbf16>
    %c0_18 = arith.constant 0 : index
    %c0_19 = arith.constant 0 : index
    %54 = vector.load %arg6[%c0_18, %c0_19] : memref<128x128xbf16, #tpu.memory_space<vmem>>, vector<128x128xbf16>
    %cst_20 = arith.constant dense<0.000000e+00> : vector<2x128xf32>
    %55 = tpu.matmul %53, %54, %cst_20 {dimension_numbers = #tpu.dot_dimension_numbers<[1], [0], [0], [1], [0, 0, 1, 1], [], []>} : vector<2x128xbf16>, vector<128x128xbf16>, vector<2x128xf32> -> vector<2x128xf32>
    %c0_21 = arith.constant 0 : index
    %c0_22 = arith.constant 0 : index
    %56 = vector.load %arg7[%c0_21, %c0_22] : memref<1x128xf32, #tpu.memory_space<vmem>>, vector<1x128xf32>
    %57 = vector.broadcast %56 : vector<1x128xf32> to vector<2x128xf32>
    %58 = arith.addf %55, %57 : vector<2x128xf32>
    %cst_23 = arith.constant dense<0.000000e+00> : vector<128xf32>
    %59 = vector.multi_reduction <add>, %58, %cst_23 [0] : vector<2x128xf32> to vector<128xf32>
    %60 = vector.shape_cast %59 : vector<128xf32> to vector<1x128xf32>
    %cst_24 = arith.constant 2.000000e+00 : f32
    %61 = vector.broadcast %cst_24 : f32 to vector<1x128xf32>
    %62 = arith.divf %60, %61 : vector<1x128xf32>
    %63 = vector.broadcast %62 : vector<1x128xf32> to vector<2x128xf32>
    %64 = arith.subf %58, %63 : vector<2x128xf32>
    %65 = arith.mulf %64, %64 : vector<2x128xf32>
    %cst_25 = arith.constant dense<0.000000e+00> : vector<128xf32>
    %66 = vector.multi_reduction <add>, %65, %cst_25 [0] : vector<2x128xf32> to vector<128xf32>
    %67 = vector.shape_cast %66 : vector<128xf32> to vector<1x128xf32>
    %cst_26 = arith.constant 2.000000e+00 : f32
    %68 = vector.broadcast %cst_26 : f32 to vector<1x128xf32>
    %69 = arith.divf %67, %68 : vector<1x128xf32>
    %cst_27 = arith.constant 9.99999974E-6 : f32
    %70 = vector.broadcast %cst_27 : f32 to vector<1x128xf32>
    %71 = arith.addf %69, %70 : vector<1x128xf32>
    %72 = math.rsqrt %71 : vector<1x128xf32>
    %73 = vector.broadcast %72 : vector<1x128xf32> to vector<2x128xf32>
    %74 = arith.mulf %64, %73 : vector<2x128xf32>
    %c0_28 = arith.constant 0 : index
    %c0_29 = arith.constant 0 : index
    %75 = vector.load %arg8[%c0_28, %c0_29] : memref<1x128xf32, #tpu.memory_space<vmem>>, vector<1x128xf32>
    %76 = vector.broadcast %75 : vector<1x128xf32> to vector<2x128xf32>
    %77 = arith.mulf %74, %76 : vector<2x128xf32>
    %c0_30 = arith.constant 0 : index
    %c0_31 = arith.constant 0 : index
    %78 = vector.load %arg9[%c0_30, %c0_31] : memref<1x128xf32, #tpu.memory_space<vmem>>, vector<1x128xf32>
    %79 = vector.broadcast %78 : vector<1x128xf32> to vector<2x128xf32>
    %80 = arith.addf %77, %79 : vector<2x128xf32>
    %cst_32 = arith.constant 0.000000e+00 : f32
    %81 = vector.broadcast %cst_32 : f32 to vector<2x128xf32>
    %82 = arith.maximumf %80, %81 : vector<2x128xf32>
    %83 = arith.truncf %82 : vector<2x128xf32> to vector<2x128xbf16>
    %c0_33 = arith.constant 0 : index
    %c0_34 = arith.constant 0 : index
    %84 = vector.load %arg10[%c0_33, %c0_34] : memref<128x128xbf16, #tpu.memory_space<vmem>>, vector<128x128xbf16>
    %cst_35 = arith.constant dense<0.000000e+00> : vector<2x128xf32>
    %85 = tpu.matmul %83, %84, %cst_35 {dimension_numbers = #tpu.dot_dimension_numbers<[1], [0], [0], [1], [0, 0, 1, 1], [], []>} : vector<2x128xbf16>, vector<128x128xbf16>, vector<2x128xf32> -> vector<2x128xf32>
    %c0_36 = arith.constant 0 : index
    %c0_37 = arith.constant 0 : index
    %86 = vector.load %arg11[%c0_36, %c0_37] : memref<1x128xf32, #tpu.memory_space<vmem>>, vector<1x128xf32>
    %87 = vector.broadcast %86 : vector<1x128xf32> to vector<2x128xf32>
    %88 = arith.addf %85, %87 : vector<2x128xf32>
    %89 = arith.mulf %88, %88 : vector<2x128xf32>
    %cst_38 = arith.constant dense<0.000000e+00> : vector<2xf32>
    %90 = vector.multi_reduction <add>, %89, %cst_38 [1] : vector<2x128xf32> to vector<2xf32>
    %91 = vector.shape_cast %90 : vector<2xf32> to vector<2x1xf32>
    %92 = math.sqrt %91 : vector<2x1xf32>
    %cst_39 = arith.constant 9.99999996E-13 : f32
    %93 = vector.broadcast %cst_39 : f32 to vector<2x1xf32>
    %94 = arith.maximumf %92, %93 : vector<2x1xf32>
    %95 = vector.broadcast %94 : vector<2x1xf32> to vector<2x128xf32>
    %96 = arith.divf %88, %95 : vector<2x128xf32>
    %97 = arith.mulf %52, %52 : vector<2x128xf32>
    %cst_40 = arith.constant dense<0.000000e+00> : vector<2xf32>
    %98 = vector.multi_reduction <add>, %97, %cst_40 [1] : vector<2x128xf32> to vector<2xf32>
    %99 = vector.shape_cast %98 : vector<2xf32> to vector<2x1xf32>
    %100 = math.sqrt %99 : vector<2x1xf32>
    %cst_41 = arith.constant 9.99999996E-13 : f32
    %101 = vector.broadcast %cst_41 : f32 to vector<2x1xf32>
    %102 = arith.maximumf %100, %101 : vector<2x1xf32>
    %103 = vector.broadcast %102 : vector<2x1xf32> to vector<2x128xf32>
    %104 = arith.divf %52, %103 : vector<2x128xf32>
    %105 = arith.mulf %96, %104 : vector<2x128xf32>
    %cst_42 = arith.constant dense<0.000000e+00> : vector<2xf32>
    %106 = vector.multi_reduction <add>, %105, %cst_42 [1] : vector<2x128xf32> to vector<2xf32>
    %107 = vector.shape_cast %106 : vector<2xf32> to vector<2x1xf32>
    %cst_43 = arith.constant 2.000000e+00 : f32
    %108 = vector.broadcast %cst_43 : f32 to vector<2x1xf32>
    %109 = arith.mulf %108, %107 : vector<2x1xf32>
    %cst_44 = arith.constant 2.000000e+00 : f32
    %110 = vector.broadcast %cst_44 : f32 to vector<2x1xf32>
    %111 = arith.subf %110, %109 : vector<2x1xf32>
    %cst_45 = arith.constant dense<0.000000e+00> : vector<1xf32>
    %112 = vector.multi_reduction <add>, %111, %cst_45 [0] : vector<2x1xf32> to vector<1xf32>
    %113 = vector.shape_cast %112 : vector<1xf32> to vector<1x1xf32>
    %cst_46 = arith.constant 5.000000e-01 : f32
    %114 = vector.broadcast %cst_46 : f32 to vector<1x1xf32>
    %115 = arith.mulf %113, %114 : vector<1x1xf32>
    %116 = vector.shape_cast %115 : vector<1x1xf32> to vector<1x1xf32>
    %117 = vector.broadcast %116 : vector<1x1xf32> to vector<8x128xf32>
    %c0_47 = arith.constant 0 : index
    %c0_48 = arith.constant 0 : index
    %118 = vector.load %arg12[%c0_47, %c0_48] : memref<8x128xf32, #tpu.memory_space<vmem>>, vector<8x128xf32>
    tpu.vector_store %arg12[%c0_47, %c0_48], %117 {strides = array<i32>} : memref<8x128xf32, #tpu.memory_space<vmem>>, vector<8x128xf32>,
    return
  }
  func.func @transform_0(%arg0: i32) -> (i32, i32, i32) {
    %c0_i32 = arith.constant 0 : i32
    %c0_i32_0 = arith.constant 0 : i32
    %c0_i32_1 = arith.constant 0 : i32
    return %arg0, %c0_i32, %c0_i32_0 : i32, i32, i32
  }
  func.func @transform_1(%arg0: i32) -> (i32, i32) {
    %c0_i32 = arith.constant 0 : i32
    %c0_i32_0 = arith.constant 0 : i32
    %c0_i32_1 = arith.constant 0 : i32
    return %c0_i32, %c0_i32_0 : i32, i32
  }
  func.func @transform_2(%arg0: i32) -> (i32, i32) {
    %c0_i32 = arith.constant 0 : i32
    %c0_i32_0 = arith.constant 0 : i32
    %c0_i32_1 = arith.constant 0 : i32
    return %c0_i32, %c0_i32_0 : i32, i32
  }
  func.func @transform_3(%arg0: i32) -> (i32, i32) {
    %c0_i32 = arith.constant 0 : i32
    %c0_i32_0 = arith.constant 0 : i32
    %c0_i32_1 = arith.constant 0 : i32
    return %c0_i32, %c0_i32_0 : i32, i32
  }
  func.func @transform_4(%arg0: i32) -> (i32, i32) {
    %c0_i32 = arith.constant 0 : i32
    %c0_i32_0 = arith.constant 0 : i32
    %c0_i32_1 = arith.constant 0 : i32
    return %c0_i32, %c0_i32_0 : i32, i32
  }
  func.func @transform_5(%arg0: i32) -> (i32, i32) {
    %c0_i32 = arith.constant 0 : i32
    %c0_i32_0 = arith.constant 0 : i32
    %c0_i32_1 = arith.constant 0 : i32
    return %c0_i32, %c0_i32_0 : i32, i32
  }
  func.func @transform_6(%arg0: i32) -> (i32, i32) {
    %c0_i32 = arith.constant 0 : i32
    %c0_i32_0 = arith.constant 0 : i32
    %c0_i32_1 = arith.constant 0 : i32
    return %c0_i32, %c0_i32_0 : i32, i32
  }
  func.func @transform_7(%arg0: i32) -> (i32, i32) {
    %c0_i32 = arith.constant 0 : i32
    %c0_i32_0 = arith.constant 0 : i32
    %c0_i32_1 = arith.constant 0 : i32
    return %c0_i32, %c0_i32_0 : i32, i32
  }
  func.func @transform_8(%arg0: i32) -> (i32, i32) {
    %c0_i32 = arith.constant 0 : i32
    %c0_i32_0 = arith.constant 0 : i32
    %c0_i32_1 = arith.constant 0 : i32
    return %c0_i32, %c0_i32_0 : i32, i32
  }
  func.func @transform_9(%arg0: i32) -> (i32, i32) {
    %c0_i32 = arith.constant 0 : i32
    %c0_i32_0 = arith.constant 0 : i32
    %c0_i32_1 = arith.constant 0 : i32
    return %c0_i32, %c0_i32_0 : i32, i32
  }
  func.func @transform_10(%arg0: i32) -> (i32, i32) {
    %c0_i32 = arith.constant 0 : i32
    %c0_i32_0 = arith.constant 0 : i32
    %c0_i32_1 = arith.constant 0 : i32
    return %c0_i32, %c0_i32_0 : i32, i32
  }
  func.func @transform_11(%arg0: i32) -> (i32, i32) {
    %c0_i32 = arith.constant 0 : i32
    %c0_i32_0 = arith.constant 0 : i32
    return %arg0, %c0_i32 : i32, i32
  }
}

</mosaic_0001>

<bundles_post_ra>
// kernel: byol_forward.1
= control target key start
LH: loop header
LB: loop body
LE: loop exit
PB: predicated region body
PF: predicated region fallthrough
CT: control target
= control target key end

     0   :  { %s1719_s17 = smov 0   ;;  %s2069_s0 = inlined_call_operand.vmem [shape: f32[2,32,64], index: 0, kind: input, shape index: {}]   ;;  %s2070_s1 = inlined_call_operand.vmem [shape: bf16[192,256], index: 1, kind: input, shape index: {}]   ;;  %s2071_s2 = inlined_call_operand.vmem [shape: f32[1,256], index: 2, kind: input, shape index: {}]   ;;  %s2072_s3 = inlined_call_operand.vmem [shape: bf16[256,256], index: 3, kind: input, shape index: {}]   ;;  %s2073_s4 = inlined_call_operand.vmem [shape: f32[1,256], index: 4, kind: input, shape index: {}]   ;;  %s2074_s5 = inlined_call_operand.vmem [shape: bf16[128,128], index: 5, kind: input, shape index: {}]   ;;  %s2075_s6 = inlined_call_operand.vmem [shape: f32[1,128], index: 6, kind: input, shape index: {}]   ;;  %s2076_s7 = inlined_call_operand.vmem [shape: f32[1,128], index: 7, kind: input, shape index: {}]   ;;  %s2077_s8 = inlined_call_operand.vmem [shape: f32[1,128], index: 8, kind: input, shape index: {}]   ;;  %s2078_s9 = inlined_call_operand.vmem [shape: bf16[128,128], index: 9, kind: input, shape index: {}]   ;;  %s2079_s10 = inlined_call_operand.vmem [shape: f32[1,128], index: 10, kind: input, shape index: {}]   ;;  %s2080_s11 = inlined_call_operand.vmem [shape: f32[16,128], index: 11, kind: output, shape index: {}]  }
   0x1 LB: > { %s1363_s18 = sadd.s32 4294967295, %s1653_s17   ;;  %p1367_p0 = scmp.ge.s32.totalorder %s1653_s17, 1  ;;  %s1653_s17 = sphi %s1719_s17, %s21_s17  }
   0x2   : > { %p337_p1 = scmp.lt.s32.totalorder %s1653_s17, 3 }
   0x4   : > { %p338_p2 = pnand %p1367_p0, %p337_p1 }
   0x5   : > { %p376_p3 = scmp.lt.s32.totalorder (!%p338_p2), %s1363_s18, 1  ;;  %v1537_v0 = vld [vmem:[%s2070_s1 + $0x4] ss:$8 sps:$4 sm:$0xff] (!%p338_p2)   ;;  %v390_v1 = vlaneseq (!%p338_p2)  ;;  %v1539_v2 = vld [vmem:[%s2070_s1] ss:$8 sps:$4 sm:$0xff] (!%p338_p2)   ;;  %s1655_s20 = smov (!%p338_p2), 64  }
   0x6   : > { %341 = sbr.rel (%p338_p2) target bundleno = 1633 (0x661), region = 64  ;;  %636 = vmatprep.subr.bf16.mxu0 (!%p338_p2), %v1537_v0  ;;  %v1540_v3 = vld [vmem:[%s2070_s1 + $0x14] ss:$8 sps:$4 sm:$0xff] (!%p338_p2)   ;;  %v1542_v4 = vld [vmem:[%s2070_s1 + $0x10] ss:$8 sps:$4 sm:$0xff] (!%p338_p2)   ;;  %v1656_v36 = vmov (!%p338_p2), 0.0  }
   0x7   : > { %637 = vmatpush1.bf16.msra.mxu0 (!%p338_p2), %v1539_v2  ;;  %v1742_v5 = vshrl.u32 (!%p338_p2), %v390_v1, 7  ;;  %v1543_v6 = vld [vmem:[%s2070_s1 + $0x24] ss:$8 sps:$4 sm:$0xff] (!%p338_p2)   ;;  %v1545_v7 = vld [vmem:[%s2070_s1 + $0x20] ss:$8 sps:$4 sm:$0xff] (!%p338_p2)   ;;  %vm465_vm4 = vcmask (!%p338_p2), 523264  }
   0x8   : > { %638 = vmatprep.subr.bf16.mxu0 (!%p338_p2), %v1540_v3  ;;  %v1546_v18 = vld [vmem:[%s2070_s1 + $0x34] ss:$8 sps:$4 sm:$0xff] (!%p338_p2)   ;;  %v1548_v29 = vld [vmem:[%s2070_s1 + $0x30] ss:$8 sps:$4 sm:$0xff] (!%p338_p2)   ;;  %v1549_v33 = vld [vmem:[%s2070_s1 + $0x44] ss:$8 sps:$4 sm:$0xff] (!%p338_p2)  }
   0x9   : > { %v392_v11 = vadd.s32 (!%p338_p2), 8, %v1742_v5  ;;  %vm427_vm0 = vcmp.lt.s32.totalorder (!%p338_p2), %v1742_v5, 1  ;;  %v394_v12 = vadd.s32 (!%p338_p2), 24, %v1742_v5  ;;  %vm440_vm1 = vcmp.lt.s32.totalorder (!%p338_p2), %v1742_v5, 7  ;;  %v1551_v40 = vld [vmem:[%s2070_s1 + $0x40] ss:$8 sps:$4 sm:$0xff] (!%p338_p2)  }
   0xa   : > { %v1552_v42 = vld [vmem:[%s2070_s1 + $0x54] ss:$8 sps:$4 sm:$0xff] (!%p338_p2)   ;;  %v1554_v45 = vld [vmem:[%s2070_s1 + $0x50] ss:$8 sps:$4 sm:$0xff] (!%p338_p2)   ;;  %v1555_v46 = vld [vmem:[%s2070_s1 + $0x64] ss:$8 sps:$4 sm:$0xff] (!%p338_p2)  }
   0xb   : > { %639 = vmatpush1.bf16.msra.mxu0 (!%p338_p2), %v1542_v4  ;;  %v396_v26 = vand.u32 (!%p338_p2), 15, %v392_v11  ;;  %v398_v31 = vand.u32 (!%p338_p2), 15, %v394_v12  ;;  %v1557_v48 = vld [vmem:[%s2070_s1 + $0x60] ss:$8 sps:$4 sm:$0xff] (!%p338_p2)   ;;  %v1558_v49 = vld [vmem:[%s2070_s1 + $0x74] ss:$8 sps:$4 sm:$0xff] (!%p338_p2)  }
   0xc   : > { %640 = vmatprep.subr.bf16.mxu0 (!%p338_p2), %v1543_v6  ;;  %v1560_v50 = vld [vmem:[%s2070_s1 + $0x70] ss:$8 sps:$4 sm:$0xff] (!%p338_p2)   ;;  %v1561_v51 = vld [vmem:[%s2070_s1 + $0x84] ss:$8 sps:$4 sm:$0xff] (!%p338_p2)   ;;  %v1563_v52 = vld [vmem:[%s2070_s1 + $0x80] ss:$8 sps:$4 sm:$0xff] (!%p338_p2)  }
   0xd   : > { %s2084_s18 = smov (!%p376_p3, %s1363_s18), 1  ;;  %vm412_vm2 = vcmp.lt.s32.totalorder %v396_v26, 15  ;;  %vm414_vm3 = vcmp.lt.s32.totalorder %v398_v31, 15  ;;  %v1564_v53 = vld [vmem:[%s2070_s1 + $0x94] ss:$8 sps:$4 sm:$0xff]   ;;  %v395_v59 = vand.u32 15, %v1742_v5 }
   0xe   : > { %s1456_s27 = sshll.u32 %s2084_s18, 5  ;;  %v1373_v37 = vsel %vm412_vm2, 1.0, %v1656_v36  ;;  %v1374_v41 = vsel %vm414_vm3, 1.0, %v1656_v36  ;;  %v1566_v54 = vld [vmem:[%s2070_s1 + $0x90] ss:$8 sps:$4 sm:$0xff]   ;;  %v393_v60 = vadd.s32 16, %v1742_v5 }
   0xf   : > { %s380_s13 = scalar_lea.vmem %s2069_s0, %s1456_s27  ;;  %641 = vmatpush1.bf16.msra.mxu0 %v1545_v7  ;;  %v1567_v55 = vld [vmem:[%s2070_s1 + $0xa4] ss:$8 sps:$4 sm:$0xff]   ;;  %v1569_v56 = vld [vmem:[%s2070_s1 + $0xa0] ss:$8 sps:$4 sm:$0xff]   ;;  %v1570_v57 = vld [vmem:[%s2070_s1 + $0xb4] ss:$8 sps:$4 sm:$0xff]  }
  0x10   : > { %v386_v8 = vld [vmem:[%s380_s13] sm:$0xff]  ;;  %v387_v9 = vld [vmem:[%s380_s13 + $0x8] sm:$0xff]  ;;  %v388_v10 = vld [vmem:[%s380_s13 + $0x10] sm:$0xff]  ;;  %642 = vmatprep.subr.bf16.mxu0 %v1546_v18  ;;  %vm399_vm5 = vcmp.gt.s32.totalorder %v395_v59, 0  ;;  %v397_v61 = vand.u32 15, %v393_v60  ;;  %vm711_vm10 = vcmask 261120  }
  0x11   : > { %v424_v13 = vrot.slane %v387_v9, 7  ;;  %v437_v14 = vrot.slane %v387_v9, 1  ;;  %v1527_v15 = vpack.i.bf16 %v387_v9, %v386_v8  ;;  %v423_v16 = vrot.slane %v386_v8, 7  ;;  %v389_v17 = vld [vmem:[%s380_s13 + $0x18] sm:$0xff]  ;;  %v1575_v18 = vld [vmem:[%s2072_s3] ss:$8 sps:$4 sm:$0xff]  }
  0x12   : > { %v436_v19 = vrot.slane %v386_v8, 1  ;;  %v426_v20 = vrot.slane %v389_v17, 7  ;;  %v439_v21 = vrot.slane %v389_v17, 1  ;;  %v1532_v22 = vpack.i.bf16 %v389_v17, %v388_v10  ;;  %v1572_v58 = vld [vmem:[%s2070_s1 + $0xb0] ss:$8 sps:$4 sm:$0xff]   ;;  %s1370_s27 = sshll.u32 %s2084_s18, 3 }
  0x13   : > { %1528 = vrot.lane.b32.xlu0 %v1527_v15, %s1655_s20  ;;  %v425_v23 = vrot.slane %v388_v10, 7  ;;  %v438_v24 = vrot.slane %v388_v10, 1  ;;  %v1763_v25 = vsel %vm427_vm0, %v423_v16, %v424_v13  ;;  %643 = vmatpush1.bf16.msra.mxu0 %v1548_v29  ;;  %v1371_v62 = vsel %vm399_vm5, 1.0, %v1656_v36  ;;  %v1573_v17 = vld [vmem:[%s2072_s3 + $0x4] ss:$8 sps:$4 sm:$0xff]   ;;  %s384_s30 = scalar_lea.vmem %s2080_s11, %s1370_s27 }
  0x14   : > { %v431_v27 = vsel %vm427_vm0, %v426_v20, %v423_v16  ;;  %v444_v28 = vsel %vm440_vm1, %v439_v21, %v436_v19  ;;  %v443_v38 = vsel %vm440_vm1, %v436_v19, %v437_v14  ;;  %644 = vmatprep.subr.bf16.mxu0 %v1549_v33  ;;  %vm401_vm6 = vcmp.gt.s32.totalorder %v397_v61, 0  ;;  %v1576_v19 = vld [vmem:[%s2072_s3 + $0x14] ss:$8 sps:$4 sm:$0xff]   ;;  %962 = vmatprep.subr.bf16.mxu1 %v1573_v17  ;;  %v1587_v26 = vld [vmem:[%s2072_s3 + $0x40] ss:$8 sps:$4 sm:$0xff]  }
  0x15   : > { %v442_v30 = vsel %vm440_vm1, %v437_v14, %v438_v24  ;;  %v1776_v32 = vsel %vm440_vm1, %v438_v24, %v439_v21  ;;  %v1783_v34 = vsel %vm427_vm0, %v425_v23, %v426_v20  ;;  %v429_v35 = vsel %vm427_vm0, %v424_v13, %v425_v23  ;;  %963 = vmatpush1.bf16.msra.mxu1 %v1575_v18  ;;  %v1578_v20 = vld [vmem:[%s2072_s3 + $0x10] ss:$8 sps:$4 sm:$0xff]   ;;  %v1579_v21 = vld [vmem:[%s2072_s3 + $0x24] ss:$8 sps:$4 sm:$0xff]   ;;  %v1582_v23 = vld [vmem:[%s2072_s3 + $0x34] ss:$8 sps:$4 sm:$0xff]  }
  0x16   : > { %v446_v39 = vmul.f32 %v1373_v37, %v442_v30  ;;  %v448_v44 = vmul.f32 %v1374_v41, %v444_v28  ;;  %v432_v63 = vmul.f32 %v1371_v62, %v431_v27  ;;  %v1372_v2 = vsel %vm401_vm6, 1.0, %v1656_v36  ;;  %964 = vmatprep.subr.bf16.mxu1 %v1576_v19  ;;  %v1584_v24 = vld [vmem:[%s2072_s3 + $0x30] ss:$8 sps:$4 sm:$0xff]   ;;  %v1588_v27 = vld [vmem:[%s2072_s3 + $0x54] ss:$8 sps:$4 sm:$0xff]  }
  0x17   : > { %1533 = vrot.lane.b32.xlu0 %v1532_v22, %s1655_s20  ;;  %645 = vmatpush1.bf16.msra.mxu0 %v1551_v40  ;;  %v434_v8 = vmul.f32 %v1372_v2, %v429_v35  ;;  %v1657_v16 = vmov 0   ;;  %v1581_v22 = vld [vmem:[%s2072_s3 + $0x20] ss:$8 sps:$4 sm:$0xff]   ;;  %v1590_v28 = vld [vmem:[%s2072_s3 + $0x50] ss:$8 sps:$4 sm:$0xff]   ;;  %v698_v62 = vand.u32 127, %v390_v1 }
  0x18   : > { %v471_v43 = vpack.c.bf16 %v446_v39, %v443_v38  ;;  %v473_v47 = vpack.c.bf16 %v448_v44, %v1776_v32  ;;  %646 = vmatprep.subr.bf16.mxu0 %v1552_v42  ;;  %v1591_v29 = vld [vmem:[%s2072_s3 + $0x64] ss:$8 sps:$4 sm:$0xff]   ;;  %v1593_v30 = vld [vmem:[%s2072_s3 + $0x60] ss:$8 sps:$4 sm:$0xff]   ;;  %v1594_v31 = vld [vmem:[%s2072_s3 + $0x74] ss:$8 sps:$4 sm:$0xff]  }
  0x19   : > { %965 = vmatpush1.bf16.msra.mxu1 %v1578_v20  ;;  %v1596_v32 = vld [vmem:[%s2072_s3 + $0x70] ss:$8 sps:$4 sm:$0xff]   ;;  %v1597_v33 = vld [vmem:[%s2072_s3 + $0x84] ss:$8 sps:$4 sm:$0xff]   ;;  %v1600_v35 = vld [vmem:[%s2072_s3 + $0x94] ss:$8 sps:$4 sm:$0xff]  }
  0x1a   : > { %1399 = vmatprep.mubr.msk.bf16.mxu0 %vm465_vm4, %v471_v43  ;;  %966 = vmatprep.subr.bf16.mxu1 %v1579_v21  ;;  %v1602_v37 = vld [vmem:[%s2072_s3 + $0x90] ss:$8 sps:$4 sm:$0xff]   ;;  %v1603_v38 = vld [vmem:[%s2072_s3 + $0xa4] ss:$8 sps:$4 sm:$0xff]   ;;  %v1605_v39 = vld [vmem:[%s2072_s3 + $0xa0] ss:$8 sps:$4 sm:$0xff]  }
  0x1b   : > { %647 = vmatpush1.bf16.msra.mxu0 %v1554_v45  ;;  %v1606_v40 = vld [vmem:[%s2072_s3 + $0xb4] ss:$8 sps:$4 sm:$0xff]   ;;  %v1608_v41 = vld [vmem:[%s2072_s3 + $0xb0] ss:$8 sps:$4 sm:$0xff]   ;;  %v1609_v42 = vld [vmem:[%s2072_s3 + $0xc4] ss:$8 sps:$4 sm:$0xff]  }
  0x1c   : > { %648 = vmatprep.subr.bf16.mxu0 %v1555_v46  ;;  %v1611_v43 = vld [vmem:[%s2072_s3 + $0xc0] ss:$8 sps:$4 sm:$0xff]   ;;  %v1612_v44 = vld [vmem:[%s2072_s3 + $0xd4] ss:$8 sps:$4 sm:$0xff]   ;;  %v1614_v45 = vld [vmem:[%s2072_s3 + $0xd0] ss:$8 sps:$4 sm:$0xff]  }
  0x1d   : > { %967 = vmatpush1.bf16.msra.mxu1 %v1581_v22  ;;  %v1615_v46 = vld [vmem:[%s2072_s3 + $0xe4] ss:$8 sps:$4 sm:$0xff]   ;;  %v699_v2 = vmul.u32 16, %v1742_v5  ;;  %vm1658_vm11 = vmmov 0   ;;  %vm1115_vm12 = vcmask 1041408  }
  0x1e   : > { %968 = vmatprep.subr.bf16.mxu1 %v1582_v23 }
  0x1f   : > { %649 = vmatpush1.bf16.msra.mxu0 %v1557_v48  ;;  %v502_v48 = vsub.s32 0, %v1742_v5  ;;  %vm1951_vm7 = vcmp.ge.s32.totalorder %v698_v62, %v699_v2 }
  0x20   : > { %650 = vmatprep.subr.bf16.mxu0 %v1558_v49  ;;  %v498_v49 = vld [vmem:[%s2071_s2] sm:$0x3] }
  0x21   : > { %969 = vmatpush1.bf16.msra.mxu1 %v1584_v24 }
  0x23   : > { %651 = vmatpush1.bf16.msra.mxu0 %v1560_v50  ;;  %v506_v50 = vsub.s32 1, %v1742_v5 }
  0x24   : > { %652 = vmatprep.subr.bf16.mxu0 %v1561_v51  ;;  %v503_v51 = vrot.slane %v498_v49, %v502_v48 }
  0x27   : > { %653 = vmatpush1.bf16.msra.mxu0 %v1563_v52  ;;  %v507_v52 = vrot.slane %v498_v49, %v506_v50 }
  0x28   : > { %654 = vmatprep.subr.bf16.mxu0 %v1564_v53 }
  0x2b   : > { %655 = vmatpush1.bf16.msra.mxu0 %v1566_v54 }
  0x2c   : > { %656 = vmatprep.subr.bf16.mxu0 %v1567_v55 }
  0x2f   : > { %657 = vmatpush1.bf16.msra.mxu0 %v1569_v56  ;;  %v701_v56 = vadd.s32 1, %v1742_v5 }
  0x30   : > { %658 = vmatprep.subr.bf16.mxu0 %v1570_v57 }
  0x33   : > { %659 = vmatpush1.bf16.msra.mxu0 %v1572_v58 }
  0x85   : > { %v1529_v0 = vpop.permute.xlu0 %1528 }
  0x86   : > { %v1531_v3 = vunpack.i.h.bf16 %v1529_v0  ;;  %v1530_v4 = vunpack.i.l.bf16 %v1529_v0 }
  0x88   : > { %v466_v6 = vsel %vm465_vm4, %v432_v63, %v1530_v4  ;;  %v467_v7 = vsel %vm465_vm4, %v1763_v25, %v1531_v3  ;;  %v1585_v25 = vld [vmem:[%s2072_s3 + $0x44] ss:$8 sps:$4 sm:$0xff]   ;;  %v702_v3 = vmul.u32 16, %v701_v56 }
  0x89   : > { %v470_v9 = vpack.c.bf16 %v467_v7, %v466_v6  ;;  %v1534_v10 = vpop.permute.xlu0 %1533  ;;  %970 = vmatprep.subr.bf16.mxu1 %v1585_v25  ;;  %v1618_v25 = vld [vmem:[%s2072_s3 + $0xf4] ss:$8 sps:$4 sm:$0xff]   ;;  %v1634_v56 = vld [vmem:[%s2078_s9 + $0x28] sm:$0xff]  }
  0x8a   : > { %v1536_v11 = vunpack.i.h.bf16 %v1534_v10  ;;  %v1535_v12 = vunpack.i.l.bf16 %v1534_v10  ;;  %971 = vmatpush1.bf16.msra.mxu1 %v1587_v26  ;;  %vm703_vm8 = vcmp.lt.s32.totalorder %v698_v62, %v702_v3  ;;  %v1620_v26 = vld [vmem:[%s2072_s3 + $0xf0] ss:$8 sps:$4 sm:$0xff]  }
  0x8b   : > { %669 = vmatmul.mubr.bf16.vlgmr.msra.gmra.mrb[0].mxu0 %v470_v9  ;;  %972 = vmatprep.subr.bf16.mxu1 %v1588_v27  ;;  %vm704_vm9 = vmand %vm1951_vm7, %vm703_vm8  ;;  %v1621_v27 = vld [vmem:[%s2074_s5] sm:$0xff]  }
  0x8c   : > { %1400 = vmatprep.mubr.msk.bf16.mxu0 %vm465_vm4, %v473_v47  ;;  %v468_v13 = vsel %vm465_vm4, %v434_v8, %v1535_v12  ;;  %v469_v14 = vsel %vm465_vm4, %v1783_v34, %v1536_v11  ;;  %v1599_v34 = vld [vmem:[%s2072_s3 + $0x80] ss:$8 sps:$4 sm:$0xff]   ;;  %v705_v22 = vsel %vm704_vm9, 0.00390625, %v1656_v36 }
  0x8d   : > { %v472_v15 = vpack.c.bf16 %v469_v14, %v468_v13  ;;  %v1617_v47 = vld [vmem:[%s2072_s3 + $0xe0] ss:$8 sps:$4 sm:$0xff]   ;;  %v706_v24 = vpack.c.bf16 %v705_v22, %v705_v22 }
  0x8e   : > { %973 = vmatpush1.bf16.msra.mxu1 %v1590_v28  ;;  %v1622_v28 = vld [vmem:[%s2074_s5 + $0x8] sm:$0xff]  }
  0x8f   : > { %974 = vmatprep.subr.bf16.mxu1 %v1591_v29  ;;  %v1623_v29 = vld [vmem:[%s2074_s5 + $0x10] sm:$0xff]  }
  0x92   : > { %975 = vmatpush1.bf16.msra.mxu1 %v1593_v30  ;;  %v1624_v30 = vld [vmem:[%s2074_s5 + $0x18] sm:$0xff]  }
  0x93   : > { %679 = vmatmul.mubr.bf16.gmra.mrb[4].mxu0 %v472_v15  ;;  %976 = vmatprep.subr.bf16.mxu1 %v1594_v31  ;;  %v1625_v31 = vld [vmem:[%s2074_s5 + $0x20] sm:$0xff]  }
  0x94   : > { %747 = vmatprep.mubr.bf16.mxu0 %v1657_v16 }
  0x96   : > { %977 = vmatpush1.bf16.msra.mxu1 %v1596_v32  ;;  %v1626_v32 = vld [vmem:[%s2074_s5 + $0x28] sm:$0xff]  }
  0x97   : > { %978 = vmatprep.subr.bf16.mxu1 %v1597_v33  ;;  %v1627_v33 = vld [vmem:[%s2074_s5 + $0x30] sm:$0xff]  }
  0x9a   : > { %979 = vmatpush1.bf16.msra.mxu1 %v1599_v34 }
  0x9b   : > { %980 = vmatprep.subr.bf16.mxu1 %v1600_v35 }
  0x9e   : > { %981 = vmatpush1.bf16.msra.mxu1 %v1602_v37 }
  0x9f   : > { %982 = vmatprep.subr.bf16.mxu1 %v1603_v38 }
  0xa2   : > { %983 = vmatpush1.bf16.msra.mxu1 %v1605_v39 }
  0xa3   : > { %984 = vmatprep.subr.bf16.mxu1 %v1606_v40 }
  0xa6   : > { %985 = vmatpush1.bf16.msra.mxu1 %v1608_v41  ;;  %v1628_v41 = vld [vmem:[%s2074_s5 + $0x38] sm:$0xff]  }
  0xa7   : > { %986 = vmatprep.subr.bf16.mxu1 %v1609_v42  ;;  %v2002_v42 = vld [vmem:[%s2073_s4] sm:$0x3] }
  0xaa   : > { %987 = vmatpush1.bf16.msra.mxu1 %v1611_v43  ;;  %v795_v43 = vrot.slane %v2002_v42, %v502_v48  ;;  %v1631_v48 = vld [vmem:[%s2078_s9 + $0x10] sm:$0xff]  }
  0xab   : > { %988 = vmatprep.subr.bf16.mxu1 %v1612_v44 }
  0xae   : > { %989 = vmatpush1.bf16.msra.mxu1 %v1614_v45 }
  0xaf   : > { %990 = vmatprep.subr.bf16.mxu1 %v1615_v46 }
  0xb2   : > { %991 = vmatpush1.bf16.msra.mxu1 %v1617_v47 }
  0xb3   : > { %992 = vmatprep.subr.bf16.mxu1 %v1618_v25 }
  0xb6   : > { %993 = vmatpush1.bf16.msra.mxu1 %v1620_v26 }
  0xb7   : > { %1495 = vmatprep.subr.bf16.mxu1 %v1656_v36 }
 0x15e   : > { %v670_v53 = vpop.f32.mrb[0].mxu0 }
 0x15f   : > { %v671_v54 = vadd.f32 %v670_v53, %v503_v51  ;;  %v672_v55 = vpop.f32.mrb[1].mxu0  ;;  %v1630_v53 = vld [vmem:[%s2078_s9 + $0x8] sm:$0xff]  }
 0x160   : > { %v673_v57 = vadd.f32 %v672_v55, %v507_v52  ;;  %v674_v58 = vpop.f32.mrb[2].mxu0  ;;  %v1633_v55 = vld [vmem:[%s2078_s9 + $0x20] sm:$0xff]  }
 0x161   : > { %v675_v59 = vadd.f32 %v674_v58, %v503_v51  ;;  %v676_v60 = vpop.f32.mrb[3].mxu0  ;;  %v689_v63 = vmax.f32 %v671_v54, 0.0  ;;  %v1632_v54 = vld [vmem:[%s2078_s9 + $0x18] sm:$0xff]  }
 0x162   : > { %v677_v61 = vadd.f32 %v676_v60, %v507_v52  ;;  %v690_v4 = vmax.f32 %v673_v57, 0.0  ;;  %v1635_v57 = vld [vmem:[%s2078_s9 + $0x30] sm:$0xff]   ;;  %v1636_v58 = vld [vmem:[%s2078_s9 + $0x38] sm:$0xff]  }
 0x163   : > { %v691_v0 = vmax.f32 %v675_v59, 0.0  ;;  %v1434_v59 = vld [vmem:[%s2075_s6] ss:$0 sm:$0xff] }
 0x164   : > { %v692_v6 = vmax.f32 %v677_v61, 0.0 }
 0x165   : > { %v707_v7 = vpack.c.bf16 %v691_v0, %v689_v63 }
 0x166   : > { %v708_v8 = vpack.c.bf16 %v692_v6, %v690_v4  ;;  %v680_v9 = vpop.f32.mrb[4].mxu0 }
 0x167   : > { %v681_v10 = vadd.f32 %v680_v9, %v503_v51  ;;  %v682_v11 = vpop.f32.mrb[5].mxu0 }
 0x168   : > { %v683_v13 = vadd.f32 %v682_v11, %v507_v52  ;;  %v684_v14 = vpop.f32.mrb[6].mxu0  ;;  %715 = vmatprep.subr.bf16.mxu0 %v708_v8 }
 0x169   : > { %v685_v1 = vadd.f32 %v684_v14, %v503_v51  ;;  %v686_v15 = vpop.f32.mrb[7].mxu0  ;;  %716 = vmatpush1.bf16.msra.mxu0 %v707_v7  ;;  %v693_v17 = vmax.f32 %v681_v10, 0.0 }
 0x16a   : > { %v687_v16 = vadd.f32 %v686_v15, %v507_v52  ;;  %v694_v19 = vmax.f32 %v683_v13, 0.0  ;;  %v1629_v52 = vld [vmem:[%s2078_s9] sm:$0xff]  }
 0x16b   : > { %v695_v18 = vmax.f32 %v685_v1, 0.0 }
 0x16c   : > { %v696_v20 = vmax.f32 %v687_v16, 0.0 }
 0x16d   : > { %v709_v21 = vpack.c.bf16 %v695_v18, %v693_v17 }
 0x16e   : > { %v710_v23 = vpack.c.bf16 %v696_v20, %v694_v19 }
 0x170   : > { %717 = vmatprep.subr.bf16.mxu0 %v710_v23  ;;  %v1444_v23 = vld [vmem:[%s2077_s8] ss:$0 sm:$0xff] }
 0x171   : > { %718 = vmatpush1.bf16.msra.mxu0 %v709_v21  ;;  %v1443_v21 = vld [vmem:[%s2076_s7] ss:$0 sm:$0xff] }
 0x172   : > { %1475 = vmatprep.subr.bf16.mxu0 %v1656_v36 }
 0x174   : > { %1401 = vmatmul.mubr.msk.bf16.vlgmr.msra.gmra.mrb[8].mxu0 %vm711_vm10, %v706_v24 }
 0x175   : > { %1476 = vmatpush3.bf16.msra.mxu0 %v1621_v27  ;;  %1491 = vmatprep.mubr.msk.bf16.mxu0 %vm1658_vm11, %v1656_v36 }
 0x176   : > { %1477 = vmatprep.subr.bf16.mxu0 %v1656_v36 }
 0x179   : > { %1478 = vmatpush3.bf16.msra.mxu0 %v1622_v28  ;;  %v799_v28 = vrot.slane %v2002_v42, %v506_v50 }
 0x17a   : > { %1479 = vmatprep.subr.bf16.mxu0 %v1656_v36 }
 0x17d   : > { %1480 = vmatpush3.bf16.msra.mxu0 %v1623_v29  ;;  %v1445_v29 = vld [vmem:[%s2079_s10] ss:$0 sm:$0xff] }
 0x17e   : > { %1481 = vmatprep.subr.bf16.mxu0 %v1656_v36 }
 0x181   : > { %1482 = vmatpush3.bf16.msra.mxu0 %v1624_v30 }
 0x182   : > { %1483 = vmatprep.subr.bf16.mxu0 %v1656_v36 }
 0x185   : > { %1484 = vmatpush3.bf16.msra.mxu0 %v1625_v31 }
 0x186   : > { %1485 = vmatprep.subr.bf16.mxu0 %v1656_v36 }
 0x189   : > { %1486 = vmatpush3.bf16.msra.mxu0 %v1626_v32 }
 0x18a   : > { %1487 = vmatprep.subr.bf16.mxu0 %v1656_v36 }
 0x18d   : > { %1488 = vmatpush3.bf16.msra.mxu0 %v1627_v33 }
 0x18e   : > { %1489 = vmatprep.subr.bf16.mxu0 %v1656_v36 }
 0x191   : > { %1490 = vmatpush3.bf16.msra.mxu0 %v1628_v41 }
 0x247   : > { %v749_v34 = vpop.f32.mrb[8].mxu0 }
 0x248   : > { %v751_v35 = vpop.f32.mrb[9].mxu0  ;;  %v756_v39 = vpack.c.bf16 %v749_v34, %v749_v34 }
 0x249   : > { %v753_v37 = vpop.f32.mrb[10].mxu0  ;;  %v757_v38 = vpack.c.bf16 %v751_v35, %v751_v35 }
 0x24a   : > { %v754_v40 = vpop.f32.mrb[11].mxu0 }
 0x24b   : > { %994 = vmatprep.mubr.bf16.mxu1 %v757_v38 }
 0x24c   : > { %995 = vmatmul.mubr.bf16.vlgmr.msra.gmra.mrb[0].mxu1 %v756_v39 }
 0x24d   : > { %1511 = vmatprep.mubr.msk.bf16.mxu1 %vm1658_vm11, %v1656_v36  ;;  %1496 = vmatpush3.bf16.msra.mxu1 %v1629_v52 }
 0x24e   : > { %1497 = vmatprep.subr.bf16.mxu1 %v1656_v36 }
 0x251   : > { %1498 = vmatpush3.bf16.msra.mxu1 %v1630_v53 }
 0x252   : > { %1499 = vmatprep.subr.bf16.mxu1 %v1656_v36 }
 0x255   : > { %1500 = vmatpush3.bf16.msra.mxu1 %v1631_v48 }
 0x256   : > { %1501 = vmatprep.subr.bf16.mxu1 %v1656_v36 }
 0x259   : > { %1502 = vmatpush3.bf16.msra.mxu1 %v1632_v54 }
 0x25a   : > { %1503 = vmatprep.subr.bf16.mxu1 %v1656_v36 }
 0x25d   : > { %1504 = vmatpush3.bf16.msra.mxu1 %v1633_v55 }
 0x25e   : > { %1505 = vmatprep.subr.bf16.mxu1 %v1656_v36 }
 0x261   : > { %1506 = vmatpush3.bf16.msra.mxu1 %v1634_v56 }
 0x262   : > { %1507 = vmatprep.subr.bf16.mxu1 %v1656_v36 }
 0x265   : > { %1508 = vmatpush3.bf16.msra.mxu1 %v1635_v57 }
 0x266   : > { %1509 = vmatprep.subr.bf16.mxu1 %v1656_v36 }
 0x269   : > { %1510 = vmatpush3.bf16.msra.mxu1 %v1636_v58 }
 0x31f   : > { %v996_v44 = vpop.f32.mrb[0].mxu1 }
 0x320   : > { %v997_v45 = vadd.f32 %v996_v44, %v795_v43  ;;  %v2007_v46 = vpop.f32.mrb[1].mxu1 }
 0x321   : > { %v1000_v47 = vpop.f32.mrb[2].mxu1  ;;  %v999_v31 = vadd.f32 %v2007_v46, %v799_v28 }
 0x322   : > { %v1003_v49 = vpack.c.bf16 %v997_v45, %v997_v45  ;;  %v1001_v51 = vpop.f32.mrb[3].mxu1 }
 0x323   : > { %v1281_v39 = vmul.f32 %v999_v31, %v999_v31 }
 0x324   : > { %1492 = vmatmul.mubr.bf16.vlgmr.msra.gmra.mrb[12].mxu0 %v1003_v49 }
 0x325   : > { %v1282_v5 = vsel %vm1115_vm12, %v1281_v39, 0.0 }
 0x3f7   : > { %v1109_v60 = vpop.f32.mrb[12].mxu0 }
 0x3f8   : > { %v1110_v61 = vadd.f32 %v1434_v59, %v1109_v60  ;;  %v1493_v62 = vpop.f32.mrb[13].mxu0 }
 0x3f9   : > { %v1112_v63 = vpop.f32.mrb[14].mxu0 }
 0x3fa   : > { %v1116_v0 = vsel %vm1115_vm12, %v1110_v61, 0.0  ;;  %v1494_v2 = vpop.f32.mrb[15].mxu0 }
 0x3fb   : > { %v1117_v3 = vrot.slane %v1116_v0, 4 }
 0x3fd   : > { %v1118_v4 = vadd.f32 %v1117_v3, %v1116_v0 }
 0x3ff   : > { %v1119_v6 = vrot.slane %v1118_v4, 2 }
 0x401   : > { %v1120_v7 = vadd.f32 %v1119_v6, %v1118_v4 }
 0x403   : > { %v1121_v8 = vrot.slane %v1120_v7, 1 }
 0x405   : > { %v1122_v9 = vadd.f32 %v1121_v8, %v1120_v7 }
 0x407   : > { %v1124_v36 = vmul.f32 0.5, %v1122_v9 }
 0x409   : > { %v1125_v10 = vsub.f32 %v1110_v61, %v1124_v36 }
 0x40b   : > { %v1126_v11 = vmul.f32 %v1125_v10, %v1125_v10 }
 0x40d   : > { %v1127_v12 = vsel %vm1115_vm12, %v1126_v11, 0.0 }
 0x40e   : > { %v1128_v13 = vrot.slane %v1127_v12, 4 }
 0x410   : > { %v1129_v14 = vadd.f32 %v1128_v13, %v1127_v12 }
 0x412   : > { %v1130_v1 = vrot.slane %v1129_v14, 2 }
 0x414   : > { %v1131_v15 = vadd.f32 %v1130_v1, %v1129_v14 }
 0x416   : > { %v1132_v16 = vrot.slane %v1131_v15, 1 }
 0x418   : > { %v1133_v17 = vadd.f32 %v1132_v16, %v1131_v15 }
 0x41a   : > { %v1134_v18 = vmul.f32 0.5, %v1133_v17 }
 0x41c   : > { %v1135_v19 = vadd.f32 1e-05, %v1134_v18 }
 0x41e   : > { %1637 = vrsqrt.f32 %v1135_v19 }
 0x428   : > { %v1638_v20 = vpop.eup %1637 }
 0x429   : > { %v1137_v22 = vmul.f32 %v1638_v20, %v1125_v10 }
 0x42b   : > { %v1145_v24 = vmul.f32 %v1443_v21, %v1137_v22 }
 0x42d   : > { %v1153_v25 = vadd.f32 %v1444_v23, %v1145_v24 }
 0x42f   : > { %v1154_v26 = vmax.f32 %v1153_v25, 0.0 }
 0x431   : > { %v1155_v27 = vpack.c.bf16 %v1154_v26, %v1154_v26 }
 0x433   : > { %1512 = vmatmul.mubr.bf16.vlgmr.msra.gmra.mrb[4].mxu1 %v1155_v27 }
 0x506   : > { %v1261_v30 = vpop.f32.mrb[4].mxu1 }
 0x507   : > { %v1262_v32 = vadd.f32 %v1445_v29, %v1261_v30  ;;  %v1513_v33 = vpop.f32.mrb[5].mxu1 }
 0x508   : > { %v1264_v34 = vpop.f32.mrb[6].mxu1 }
 0x509   : > { %v1514_v35 = vpop.f32.mrb[7].mxu1  ;;  %v1267_v37 = vmul.f32 %v1262_v32, %v1262_v32 }
 0x50b   : > { %v1268_v38 = vsel %vm1115_vm12, %v1267_v37, 0.0 }
 0x50c   : > { %1269 = vadd.xlane.f32.xlu1 %v1268_v38 }
 0x510   : > { %1283 = vadd.xlane.f32.xlu1 %v1282_v5 }
 0x599   : > { %v1270_v50 = vpop.xlane.xlu1 %1269 }
 0x59a   : > { %1639 = vrsqrt.f32 %v1270_v50  ;;  %vm1273_vm13 = vcmp.eq.f32.partialorder %v1270_v50, inf  ;;  %v1276_v43 = vand.u32 2147483648, %v1270_v50  ;;  %vm1275_vm14 = vcmp.eq.f32.partialorder %v1270_v50, 0.0 }
 0x59d   : > { %v1284_v40 = vpop.xlane.xlu1 %1283 }
 0x59e   : > { %1641 = vrsqrt.f32 %v1284_v40  ;;  %vm1287_vm15 = vcmp.eq.f32.partialorder %v1284_v40, inf  ;;  %v1290_v51 = vand.u32 2147483648, %v1284_v40  ;;  %vm1289_vm0 = vcmp.eq.f32.partialorder %v1284_v40, 0.0 }
 0x5a4   : > { %v1640_v41 = vpop.eup %1639 }
 0x5a5   : > { %v1272_v42 = vmul.f32 %v1640_v41, %v1270_v50 }
 0x5a7   : > { %v1274_v44 = vsel %vm1273_vm13, %v1270_v50, %v1272_v42 }
 0x5a8   : > { %v1642_v45 = vpop.eup %1641  ;;  %v1277_v46 = vsel %vm1275_vm14, %v1276_v43, %v1274_v44 }
 0x5a9   : > { %v1278_v47 = vmax.f32 %v1277_v46, 1e-12  ;;  %v1286_v49 = vmul.f32 %v1642_v45, %v1284_v40 }
 0x5ab   : > { %v1288_v52 = vsel %vm1287_vm15, %v1284_v40, %v1286_v49  ;;  %1643 = vrcp.f32 %v1278_v47 }
 0x5ac   : > { %v1291_v53 = vsel %vm1289_vm0, %v1290_v51, %v1288_v52 }
 0x5ad   : > { %v1292_v48 = vmax.f32 %v1291_v53, 1e-12 }
 0x5af   : > { %1645 = vrcp.f32 %v1292_v48 }
 0x5b5   : > { %v1644_v54 = vpop.eup %1643 }
 0x5b6   : > { %v1280_v56 = vmul.f32 %v1644_v54, %v1262_v32 }
 0x5b9   : > { %v1646_v55 = vpop.eup %1645 }
 0x5ba   : > { %v1294_v57 = vmul.f32 %v1646_v55, %v999_v31 }
 0x5bc   : > { %v1295_v58 = vmul.f32 %v1294_v57, %v1280_v56 }
 0x5be   : > { %v1296_v59 = vsel %vm1115_vm12, %v1295_v58, 0.0 }
 0x5bf   : > { %1297 = vadd.xlane.f32.xlu0 %v1296_v59 }
 0x64c   : > { %v1298_v60 = vpop.xlane.xlu0 %1297 }
 0x64d   : > { %v1299_v61 = vmul.f32 2.0, %v1298_v60 }
 0x64f   : > { %v1300_v62 = vsub.f32 2.0, %v1299_v61 }
 0x651   : > { %v1301_v63 = vsel %vm1115_vm12, %v1300_v62, 0.0 }
 0x652   : > { %v1302_v0 = vrot.slane %v1301_v63, 4 }
 0x654   : > { %v1303_v2 = vadd.f32 %v1302_v0, %v1301_v63 }
 0x656   : > { %v1304_v3 = vrot.slane %v1303_v2, 2 }
 0x658   : > { %v1305_v4 = vadd.f32 %v1304_v3, %v1303_v2 }
 0x65a   : > { %v1306_v6 = vrot.slane %v1305_v4, 1 }
 0x65c   : > { %v1307_v7 = vadd.f32 %v1306_v6, %v1305_v4 }
 0x65e   : > { %v1308_v8 = vmul.f32 0.5, %v1307_v7 }
 0x660   : > { %1309 = vst [vmem:[%s384_s30] sm:$0xff] %v1308_v8 }
 0x661 PF: > { %s21_s17 = sadd.s32 1, %s1653_s17  }
 0x662   : > { %p18_p4 = scmp.ge.s32.totalorder %s21_s17, 4  }
 0x664   :  { %20 = sbr.rel (!%p18_p4) target bundleno = 1 (0x1), region = 94 }

</bundles_post_ra>
